<compile_context>
chip_gen: v6e
topology: v6e:2x2x1
jax: 0.10.0
libtpu: 0.0.40
codegen_flags: <defaults>
</compile_context>

<pallas_src>
import jax
import jax.numpy as jnp
from jax.experimental import pallas as pl
from jax.experimental.pallas import tpu as pltpu

PAD = 128          # padded feature / action width (full lane dim)
NEG_BIG = -1e30    # effective -inf for padded action columns


def policy_kernel(x_ref, g_ref, w1_ref, b1_ref, w2_ref, b2_ref,
                  logp_ref, act_ref, lp_ref):
    # hidden = relu(x @ W1 + b1); x / W1 are padded to 128 features (zeros).
    h = jnp.dot(x_ref[...], w1_ref[...], preferred_element_type=jnp.float32)
    h = jnp.maximum(h + b1_ref[...], 0.0)

    # logits = h @ W2p + b2p; padded action columns carry a -1e30 bias.
    logits = jnp.dot(h, w2_ref[...], preferred_element_type=jnp.float32)
    logits = logits + b2_ref[...]

    # Numerically stable log-softmax over the (padded) action axis.
    m = jnp.max(logits, axis=-1, keepdims=True)
    shifted = logits - m
    lse = jnp.log(jnp.sum(jnp.exp(shifted), axis=-1, keepdims=True))
    logp = shifted - lse                          # [TB, 128]; padded cols ~ -1e30
    logp_ref[...] = logp

    # Fused Categorical sampling via the Gumbel-max trick.
    # g_ref holds precomputed standard-Gumbel noise (padded cols never win:
    # their logp is ~-1e30).
    perturbed = logp + g_ref[...]

    col = jax.lax.broadcasted_iota(jnp.int32, logp.shape, 1)
    col_f = col.astype(jnp.float32)
    pmax = jnp.max(perturbed, axis=-1, keepdims=True)
    is_max = perturbed >= pmax
    # first index attaining the max (ties are measure-zero)
    action_f = jnp.min(jnp.where(is_max, col_f, jnp.float32(logp.shape[-1])),
                       axis=-1, keepdims=True)
    act_ref[...] = action_f.astype(jnp.int32)

    # log-prob of the sampled action (gather via masked sum).
    chosen = jnp.where(col_f == action_f, logp, 0.0)
    lp_ref[...] = jnp.sum(chosen, axis=-1, keepdims=True)


def policy_forward(state, w1, b1, w2, b2, key, *, block_b=512):
    """state: [B, 8] f32 -> (actions [B] int32, chosen_logprob [B] f32, log_probs [B, 4] f32)."""
    B, in_dim = state.shape
    hidden = w1.shape[1]
    n_actions = w2.shape[1]

    # Sublane-aligned batch tile; pad the batch so every grid block is full.
    b_up = ((B + 7) // 8) * 8
    tb = min(block_b, b_up)
    B_pad = ((b_up + tb - 1) // tb) * tb
    grid = (B_pad // tb,)

    # One-time lane-dense parameter / input prep (zero-pad 8->128, 4->128).
    x_p = jnp.zeros((B_pad, PAD), jnp.float32).at[:B, :in_dim].set(state)
    w1_p = jnp.zeros((PAD, hidden), jnp.float32).at[:in_dim, :].set(w1)
    b1_2d = b1.reshape(1, hidden).astype(jnp.float32)
    w2_p = jnp.zeros((hidden, PAD), jnp.float32).at[:, :n_actions].set(w2)
    b2_p = jnp.full((1, PAD), NEG_BIG, jnp.float32).at[0, :n_actions].set(b2)

    # Standard Gumbel noise for in-kernel categorical sampling (lane-dense slab).
    gumbel = jax.random.gumbel(key, (B_pad, PAD), jnp.float32)

    out_shapes = (
        jax.ShapeDtypeStruct((B_pad, PAD), jnp.float32),  # log-softmax slab (lane-dense)
        jax.ShapeDtypeStruct((B_pad, 1), jnp.int32),      # sampled actions
        jax.ShapeDtypeStruct((B_pad, 1), jnp.float32),    # log-prob of sampled action
    )

    logp_pad, actions, chosen_lp = pl.pallas_call(
        policy_kernel,
        out_shape=out_shapes,
        grid_spec=pltpu.PrefetchScalarGridSpec(
            num_scalar_prefetch=0,
            grid=grid,
            in_specs=[
                pl.BlockSpec((tb, PAD), lambda i: (i, 0)),       # state tile
                pl.BlockSpec((tb, PAD), lambda i: (i, 0)),       # gumbel tile
                pl.BlockSpec((PAD, hidden), lambda i: (0, 0)),   # W1 (resident)
                pl.BlockSpec((1, hidden), lambda i: (0, 0)),     # b1
                pl.BlockSpec((hidden, PAD), lambda i: (0, 0)),   # W2 (resident)
                pl.BlockSpec((1, PAD), lambda i: (0, 0)),        # b2
            ],
            out_specs=[
                pl.BlockSpec((tb, PAD), lambda i: (i, 0)),
                pl.BlockSpec((tb, 1), lambda i: (i, 0)),
                pl.BlockSpec((tb, 1), lambda i: (i, 0)),
            ],
        ),
        compiler_params=pltpu.CompilerParams(
            dimension_semantics=("parallel",)),
    )(x_p, gumbel, w1_p, b1_2d, w2_p, b2_p)

    return actions[:B, 0], chosen_lp[:B, 0], logp_pad[:B, :n_actions]


def init_params(key):
    """Deterministic init mimicking PyTorch nn.Linear defaults (U(-1/sqrt(fan_in), +))."""
    k1, k2, k3, k4 = jax.random.split(key, 4)
    bound1 = 1.0 / jnp.sqrt(8.0)
    w1 = jax.random.uniform(k1, (8, 128), jnp.float32, -bound1, bound1)
    b1 = jax.random.uniform(k2, (128,), jnp.float32, -bound1, bound1)
    bound2 = 1.0 / jnp.sqrt(128.0)
    w2 = jax.random.uniform(k3, (128, 4), jnp.float32, -bound2, bound2)
    b2 = jax.random.uniform(k4, (4,), jnp.float32, -bound2, bound2)
    return w1, b1, w2, b2


# TODO(synk): value_layer, the episode memory lists and calculateLoss() are host-side
# training bookkeeping not exercised by forward(); they are not kernelized here.

if __name__ == "__main__":
    key = jax.random.PRNGKey(0)
    pkey, skey, gkey = jax.random.split(key, 3)

    w1, b1, w2, b2 = init_params(pkey)

    # batch of 8 LunarLander observations, each 8-dimensional
    state = jax.random.normal(skey, (8, 8), dtype=jnp.float32)

    actions, chosen_lp, log_probs = policy_forward(state, w1, b1, w2, b2, gkey)
    actions, chosen_lp, log_probs = jax.block_until_ready(
        (actions, chosen_lp, log_probs))

    # --- sanity checks ---
    # 1) kernel log-softmax matches the pure-JAX reference forward
    ref_h = jnp.maximum(state @ w1 + b1, 0.0)
    ref_logp = jax.nn.log_softmax(ref_h @ w2 + b2, axis=-1)
    assert bool(jnp.allclose(log_probs, ref_logp, atol=1e-4, rtol=1e-4))
    # 2) probabilities sum to 1
    probs = jnp.exp(log_probs)
    assert bool(jnp.allclose(jnp.sum(probs, axis=-1), 1.0, atol=1e-4))
    # 3) sampled actions are valid and chosen_logprob is the gather of log_probs
    assert bool(jnp.all((actions >= 0) & (actions < 4)))
    gathered = jnp.take_along_axis(log_probs, actions[:, None], axis=-1)[:, 0]
    assert bool(jnp.allclose(chosen_lp, gathered, atol=1e-5))

    print("KERNEL_OK")
</pallas_src>

<mosaic_0001>
module attributes {stable_mosaic.version = 11 : i64} {
  func.func @policy_kernel(%arg0: i32, %arg1: memref<8x128xf32, #tpu.memory_space<vmem>>, %arg2: memref<8x128xf32, #tpu.memory_space<vmem>>, %arg3: memref<128x128xf32, #tpu.memory_space<vmem>>, %arg4: memref<1x128xf32, #tpu.memory_space<vmem>>, %arg5: memref<128x128xf32, #tpu.memory_space<vmem>>, %arg6: memref<1x128xf32, #tpu.memory_space<vmem>>, %arg7: memref<8x128xf32, #tpu.memory_space<vmem>>, %arg8: memref<8x1xi32, #tpu.memory_space<vmem>>, %arg9: memref<8x1xf32, #tpu.memory_space<vmem>>) attributes {dimension_semantics = [#tpu.dimension_semantics<parallel>], iteration_bounds = array<i64: 1>, scalar_prefetch = 0 : i64, scratch_operands = 0 : i64, tpu.core_type = #tpu.core_type<tc>, window_params = [{transform_indices = @transform_0, window_bounds = array<i64: 8, 128>}, {transform_indices = @transform_1, window_bounds = array<i64: 8, 128>}, {pipeline_mode = #tpu.pipeline_mode<synchronous>, transform_indices = @transform_2, window_bounds = array<i64: 128, 128>}, {pipeline_mode = #tpu.pipeline_mode<synchronous>, transform_indices = @transform_3, window_bounds = array<i64: 1, 128>}, {pipeline_mode = #tpu.pipeline_mode<synchronous>, transform_indices = @transform_4, window_bounds = array<i64: 128, 128>}, {pipeline_mode = #tpu.pipeline_mode<synchronous>, transform_indices = @transform_5, window_bounds = array<i64: 1, 128>}, {transform_indices = @transform_6, window_bounds = array<i64: 8, 128>}, {transform_indices = @transform_7, window_bounds = array<i64: 8, 1>}, {transform_indices = @transform_8, window_bounds = array<i64: 8, 1>}]} {
    %c0 = arith.constant 0 : index
    %c0_0 = arith.constant 0 : index
    %0 = vector.load %arg1[%c0, %c0_0] : memref<8x128xf32, #tpu.memory_space<vmem>>, vector<8x128xf32>
    %c0_1 = arith.constant 0 : index
    %c0_2 = arith.constant 0 : index
    %1 = vector.load %arg3[%c0_1, %c0_2] : memref<128x128xf32, #tpu.memory_space<vmem>>, vector<128x128xf32>
    %cst = arith.constant dense<0.000000e+00> : vector<8x128xf32>
    %2 = tpu.matmul %0, %1, %cst {dimension_numbers = #tpu.dot_dimension_numbers<[1], [0], [0], [1], [0, 0, 1, 1], [], []>} : vector<8x128xf32>, vector<128x128xf32>, vector<8x128xf32> -> vector<8x128xf32>
    %c0_3 = arith.constant 0 : index
    %c0_4 = arith.constant 0 : index
    %3 = vector.load %arg4[%c0_3, %c0_4] : memref<1x128xf32, #tpu.memory_space<vmem>>, vector<1x128xf32>
    %4 = vector.broadcast %3 : vector<1x128xf32> to vector<8x128xf32>
    %5 = arith.addf %2, %4 : vector<8x128xf32>
    %cst_5 = arith.constant 0.000000e+00 : f32
    %6 = vector.broadcast %cst_5 : f32 to vector<8x128xf32>
    %7 = arith.maximumf %5, %6 : vector<8x128xf32>
    %c0_6 = arith.constant 0 : index
    %c0_7 = arith.constant 0 : index
    %8 = vector.load %arg5[%c0_6, %c0_7] : memref<128x128xf32, #tpu.memory_space<vmem>>, vector<128x128xf32>
    %cst_8 = arith.constant dense<0.000000e+00> : vector<8x128xf32>
    %9 = tpu.matmul %7, %8, %cst_8 {dimension_numbers = #tpu.dot_dimension_numbers<[1], [0], [0], [1], [0, 0, 1, 1], [], []>} : vector<8x128xf32>, vector<128x128xf32>, vector<8x128xf32> -> vector<8x128xf32>
    %c0_9 = arith.constant 0 : index
    %c0_10 = arith.constant 0 : index
    %10 = vector.load %arg6[%c0_9, %c0_10] : memref<1x128xf32, #tpu.memory_space<vmem>>, vector<1x128xf32>
    %11 = vector.broadcast %10 : vector<1x128xf32> to vector<8x128xf32>
    %12 = arith.addf %9, %11 : vector<8x128xf32>
    %cst_11 = arith.constant dense<0xFF800000> : vector<8xf32>
    %13 = vector.multi_reduction <maximumf>, %12, %cst_11 [1] : vector<8x128xf32> to vector<8xf32>
    %14 = vector.shape_cast %13 : vector<8xf32> to vector<8x1xf32>
    %15 = vector.broadcast %14 : vector<8x1xf32> to vector<8x128xf32>
    %16 = arith.subf %12, %15 : vector<8x128xf32>
    %17 = math.exp %16 : vector<8x128xf32>
    %cst_12 = arith.constant dense<0.000000e+00> : vector<8xf32>
    %18 = vector.multi_reduction <add>, %17, %cst_12 [1] : vector<8x128xf32> to vector<8xf32>
    %19 = vector.shape_cast %18 : vector<8xf32> to vector<8x1xf32>
    %20 = math.log %19 : vector<8x1xf32>
    %21 = vector.broadcast %20 : vector<8x1xf32> to vector<8x128xf32>
    %22 = arith.subf %16, %21 : vector<8x128xf32>
    %c0_13 = arith.constant 0 : index
    %c0_14 = arith.constant 0 : index
    %23 = vector.load %arg7[%c0_13, %c0_14] : memref<8x128xf32, #tpu.memory_space<vmem>>, vector<8x128xf32>
    tpu.vector_store %arg7[%c0_13, %c0_14], %22 {strides = array<i32>} : memref<8x128xf32, #tpu.memory_space<vmem>>, vector<8x128xf32>,
    %c0_15 = arith.constant 0 : index
    %c0_16 = arith.constant 0 : index
    %24 = vector.load %arg2[%c0_15, %c0_16] : memref<8x128xf32, #tpu.memory_space<vmem>>, vector<8x128xf32>
    %25 = arith.addf %22, %24 : vector<8x128xf32>
    %26 = tpu.iota {dimensions = array<i32: 1>} : vector<8x128xi32>
    %27 = arith.sitofp %26 : vector<8x128xi32> to vector<8x128xf32>
    %cst_17 = arith.constant dense<0xFF800000> : vector<8xf32>
    %28 = vector.multi_reduction <maximumf>, %25, %cst_17 [1] : vector<8x128xf32> to vector<8xf32>
    %29 = vector.shape_cast %28 : vector<8xf32> to vector<8x1xf32>
    %30 = vector.broadcast %29 : vector<8x1xf32> to vector<8x128xf32>
    %31 = arith.cmpf oge, %25, %30 : vector<8x128xf32>
    %cst_18 = arith.constant 1.280000e+02 : f32
    %32 = vector.broadcast %cst_18 : f32 to vector<8x128xf32>
    %33 = arith.select %31, %27, %32 : vector<8x128xi1>, vector<8x128xf32>
    %cst_19 = arith.constant dense<0x7F800000> : vector<8xf32>
    %34 = vector.multi_reduction <minimumf>, %33, %cst_19 [1] : vector<8x128xf32> to vector<8xf32>
    %35 = vector.shape_cast %34 : vector<8xf32> to vector<8x1xf32>
    %36 = arith.fptosi %35 : vector<8x1xf32> to vector<8x1xi32>
    %c0_20 = arith.constant 0 : index
    %c0_21 = arith.constant 0 : index
    %37 = vector.load %arg8[%c0_20, %c0_21] : memref<8x1xi32, #tpu.memory_space<vmem>>, vector<8x1xi32>
    tpu.vector_store %arg8[%c0_20, %c0_21], %36 {strides = array<i32>} : memref<8x1xi32, #tpu.memory_space<vmem>>, vector<8x1xi32>,
    %38 = vector.broadcast %35 : vector<8x1xf32> to vector<8x128xf32>
    %39 = arith.cmpf oeq, %27, %38 : vector<8x128xf32>
    %cst_22 = arith.constant 0.000000e+00 : f32
    %40 = vector.broadcast %cst_22 : f32 to vector<8x128xf32>
    %41 = arith.select %39, %22, %40 : vector<8x128xi1>, vector<8x128xf32>
    %cst_23 = arith.constant dense<0.000000e+00> : vector<8xf32>
    %42 = vector.multi_reduction <add>, %41, %cst_23 [1] : vector<8x128xf32> to vector<8xf32>
    %43 = vector.shape_cast %42 : vector<8xf32> to vector<8x1xf32>
    %c0_24 = arith.constant 0 : index
    %c0_25 = arith.constant 0 : index
    %44 = vector.load %arg9[%c0_24, %c0_25] : memref<8x1xf32, #tpu.memory_space<vmem>>, vector<8x1xf32>
    tpu.vector_store %arg9[%c0_24, %c0_25], %43 {strides = array<i32>} : memref<8x1xf32, #tpu.memory_space<vmem>>, vector<8x1xf32>,
    return
  }
  func.func @transform_0(%arg0: i32) -> (i32, i32) {
    %c0_i32 = arith.constant 0 : i32
    %c0_i32_0 = arith.constant 0 : i32
    return %arg0, %c0_i32 : i32, i32
  }
  func.func @transform_1(%arg0: i32) -> (i32, i32) {
    %c0_i32 = arith.constant 0 : i32
    %c0_i32_0 = arith.constant 0 : i32
    return %arg0, %c0_i32 : i32, i32
  }
  func.func @transform_2(%arg0: i32) -> (i32, i32) {
    %c0_i32 = arith.constant 0 : i32
    %c0_i32_0 = arith.constant 0 : i32
    %c0_i32_1 = arith.constant 0 : i32
    return %c0_i32, %c0_i32_0 : i32, i32
  }
  func.func @transform_3(%arg0: i32) -> (i32, i32) {
    %c0_i32 = arith.constant 0 : i32
    %c0_i32_0 = arith.constant 0 : i32
    %c0_i32_1 = arith.constant 0 : i32
    return %c0_i32, %c0_i32_0 : i32, i32
  }
  func.func @transform_4(%arg0: i32) -> (i32, i32) {
    %c0_i32 = arith.constant 0 : i32
    %c0_i32_0 = arith.constant 0 : i32
    %c0_i32_1 = arith.constant 0 : i32
    return %c0_i32, %c0_i32_0 : i32, i32
  }
  func.func @transform_5(%arg0: i32) -> (i32, i32) {
    %c0_i32 = arith.constant 0 : i32
    %c0_i32_0 = arith.constant 0 : i32
    %c0_i32_1 = arith.constant 0 : i32
    return %c0_i32, %c0_i32_0 : i32, i32
  }
  func.func @transform_6(%arg0: i32) -> (i32, i32) {
    %c0_i32 = arith.constant 0 : i32
    %c0_i32_0 = arith.constant 0 : i32
    return %arg0, %c0_i32 : i32, i32
  }
  func.func @transform_7(%arg0: i32) -> (i32, i32) {
    %c0_i32 = arith.constant 0 : i32
    %c0_i32_0 = arith.constant 0 : i32
    return %arg0, %c0_i32 : i32, i32
  }
  func.func @transform_8(%arg0: i32) -> (i32, i32) {
    %c0_i32 = arith.constant 0 : i32
    %c0_i32_0 = arith.constant 0 : i32
    return %arg0, %c0_i32 : i32, i32
  }
}

</mosaic_0001>

<bundles_post_ra>
// kernel: tpu_custom_call.1
= control target key start
LH: loop header
LB: loop body
LE: loop exit
PB: predicated region body
PF: predicated region fallthrough
CT: control target
= control target key end

     0   :  { %14 = vsyncpa [#allocation3], 0  ;;  %s667_s0 = inlined_call_operand.hbm [shape: f32[8,128], index: 0, kind: input, shape index: {}]   ;;  %s668_s1 = inlined_call_operand.hbm [shape: f32[8,128], index: 1, kind: input, shape index: {}]   ;;  %s669_s2 = inlined_call_operand.hbm [shape: f32[128,128], index: 2, kind: input, shape index: {}]   ;;  %s670_s3 = inlined_call_operand.vmem [shape: f32[1,128], index: 3, kind: input, shape index: {}]   ;;  %s671_s4 = inlined_call_operand.hbm [shape: f32[128,128], index: 4, kind: input, shape index: {}]   ;;  %s672_s5 = inlined_call_operand.vmem [shape: f32[1,128], index: 5, kind: input, shape index: {}]   ;;  %s673_s6 = inlined_call_operand.hbm [shape: f32[8,128], index: 6, kind: output, shape index: {0}]   ;;  %s674_s7 = inlined_call_operand.vmem [shape: s32[8,1], index: 7, kind: output, shape index: {1}]   ;;  %s675_s8 = inlined_call_operand.vmem [shape: f32[8,1], index: 8, kind: output, shape index: {2}]  }
   0x1   :  { %15 = vsyncpa [#allocation6], 0 }
   0x2   :  { %16 = vsyncpa [#allocation9], 0 }
   0x3   :  { %17 = vsyncpa [#allocation4], 0  ;;  %s550_s27 = smov [#allocation5]   ;;  %s551_s29 = smov [#allocation2]  }
   0x4   :  { %s34_s28 = sshll.u32 %s550_s27, 4  ;;  %s24_s30 = sshll.u32 %s551_s29, 4  ;;  %s35_s28 = int_to_ptr.vmem [resolvable:$true] %s34_s28  ;;  %s25_s30 = int_to_ptr.vmem [resolvable:$true] %s24_s30 }
   0x5   :  { %s450_s9 = scalar_lea.vmem %s35_s28, 128  ;;  %p455_p1 = scmp.lt.s32.totalorder %s35_s28, %s35_s28 }
   0x6   :  { %p451_p0 = scmp.ne.s32.totalorder %s35_s28, %s450_s9  ;;  %p456_p2 = scmp.lt.s32.totalorder %s450_s9, %s450_s9 }
   0x8   :  { %p457_p3 = por %p456_p2, %p455_p1 }
   0xa   :  { %p458_p4 = pnand %p457_p3, %p451_p0 }
   0xc   :  { %461 = shalt.err (!%p458_p4)
}
   0xd   :  { %37 = dma.hbm_to_vmem [thread:$0]  %s668_s1, 128, %s35_s28, [#allocation6]  }
   0xe   :  { %s470_s12 = scalar_lea.vmem %s25_s30, 128  ;;  %p475_p6 = scmp.lt.s32.totalorder %s25_s30, %s25_s30 }
   0xf   :  { %p471_p5 = scmp.ne.s32.totalorder %s25_s30, %s470_s12  ;;  %p476_p7 = scmp.lt.s32.totalorder %s470_s12, %s470_s12 }
  0x11   :  { %p477_p8 = por %p476_p7, %p475_p6 }
  0x13   :  { %p478_p9 = pnand %p477_p8, %p471_p5 }
  0x15   :  { %481 = shalt.err (!%p478_p9)
}
  0x16   :  { %27 = dma.hbm_to_vmem [thread:$0]  %s667_s0, 128, %s25_s30, [#allocation3]  }
  0x17   :  { %s552_s15 = smov [#allocation7]  }
  0x18   :  { %s43_s16 = sshll.u32 %s552_s15, 4  ;;  %s44_s16 = int_to_ptr.vmem [resolvable:$true] %s43_s16 }
  0x19   :  { %s490_s17 = scalar_lea.vmem %s44_s16, 2048  ;;  %p495_p11 = scmp.lt.s32.totalorder %s44_s16, %s44_s16 }
  0x1a   :  { %p491_p10 = scmp.ne.s32.totalorder %s44_s16, %s490_s17  ;;  %p496_p12 = scmp.lt.s32.totalorder %s490_s17, %s490_s17 }
  0x1c   :  { %p497_p13 = por %p496_p12, %p495_p11 }
  0x1e   :  { %p498_p0 = pnand %p497_p13, %p491_p10 }
  0x20   :  { %501 = shalt.err (!%p498_p0)
}
  0x21   :  { %s553_s1 = smov 128   ;;  %s554_s18 = smov 8  }
  0x22   :  { %49 = dma.hbm_to_vmem [thread:$0]  %s669_s2, 2048, %s44_s16, [#allocation6], %s553_s1, %s553_s1, %s554_s18  }
  0x23   :  { %s555_s21 = smov [#allocation8]  }
  0x24   :  { %s57_s22 = sshll.u32 %s555_s21, 4  ;;  %s58_s22 = int_to_ptr.vmem [resolvable:$true] %s57_s22 }
  0x25   :  { %s510_s0 = scalar_lea.vmem %s58_s22, 2048  ;;  %p515_p2 = scmp.lt.s32.totalorder %s58_s22, %s58_s22 }
  0x26   :  { %p511_p1 = scmp.ne.s32.totalorder %s58_s22, %s510_s0  ;;  %p516_p3 = scmp.lt.s32.totalorder %s510_s0, %s510_s0 }
  0x28   :  { %p517_p4 = por %p516_p3, %p515_p2 }
  0x2a   :  { %p518_p5 = pnand %p517_p4, %p511_p1 }
  0x2c   :  { %521 = shalt.err (!%p518_p5)
}
  0x2d   :  { %63 = dma.hbm_to_vmem [thread:$0]  %s671_s4, 2048, %s58_s22, [#allocation9], %s553_s1, %s553_s1, %s554_s18  }
  0x2e   :  { %542 = dma.done.wait [#allocation3], 128  }
  0x2f   :  { %543 = vsyncadd [#allocation3], 4294967168 }
  0x30   :  { %544 = dma.done.wait [#allocation6], 2176  }
  0x31   :  { %545 = vsyncadd [#allocation6], 4294965120 }
  0x32   :  { %546 = dma.done.wait [#allocation9], 2048  }
  0x33   :  { %547 = vsyncadd [#allocation9], 4294965248  ;;  %v556_v0 = vmov 0.0   ;;  %vm557_vm0 = vmmov 0   ;;  %v94_v1 = vld [vmem:[#allocation7 + $0x78] sm:$0xff]  ;;  %v93_v2 = vld [vmem:[#allocation7 + $0x70] sm:$0xff]  ;;  %v279_v53 = vlaneseq }
  0x34   :  { %357 = vmatprep.subr.mxu0 %v556_v0  ;;  %389 = vmatprep.mubr.msk.f32.mxu0 %vm557_vm0, %v556_v0  ;;  %v92_v3 = vld [vmem:[#allocation7 + $0x68] sm:$0xff]  ;;  %v91_v4 = vld [vmem:[#allocation7 + $0x60] sm:$0xff]  ;;  %v188_v5 = vld [vmem:[#allocation8 + $0x78] sm:$0xff]  ;;  %vm289_vm3 = vcmask 7168   ;;  %s558_s27 = smov [#allocation10]  }
  0x35   :  { %392 = vmatprep.subr.mxu1 %v556_v0  ;;  %424 = vmatprep.mubr.msk.f32.mxu1 %vm557_vm0, %v556_v0  ;;  %v90_v6 = vld [vmem:[#allocation7 + $0x58] sm:$0xff]  ;;  %v187_v7 = vld [vmem:[#allocation8 + $0x70] sm:$0xff]  ;;  %v186_v8 = vld [vmem:[#allocation8 + $0x68] sm:$0xff]  ;;  %v280_v54 = vand.u32 127, %v279_v53  ;;  %s302_s28 = sshll.u32 %s558_s27, 4  ;;  %s303_s28 = int_to_ptr.vmem [resolvable:$true] %s302_s28 }
  0x36   :  { %358 = vmatpush3.msra.mxu0 %v94_v1  ;;  %393 = vmatpush3.msra.mxu1 %v188_v5  ;;  %v89_v9 = vld [vmem:[#allocation7 + $0x50] sm:$0xff]  ;;  %v185_v10 = vld [vmem:[#allocation8 + $0x60] sm:$0xff]  ;;  %v88_v11 = vld [vmem:[#allocation7 + $0x48] sm:$0xff]  ;;  %s522_s29 = scalar_lea.vmem %s303_s28, 128  ;;  %p527_p7 = scmp.lt.s32.totalorder %s303_s28, %s303_s28 }
  0x37   :  { %359 = vmatprep.subr.mxu0 %v556_v0  ;;  %394 = vmatprep.subr.mxu1 %v556_v0  ;;  %v184_v12 = vld [vmem:[#allocation8 + $0x58] sm:$0xff]  ;;  %v87_v13 = vld [vmem:[#allocation7 + $0x40] sm:$0xff]  ;;  %v183_v14 = vld [vmem:[#allocation8 + $0x50] sm:$0xff]  ;;  %v281_v55 = vcvt.s32.f32 %v280_v54  ;;  %p523_p6 = scmp.ne.s32.totalorder %s303_s28, %s522_s29  ;;  %p528_p8 = scmp.lt.s32.totalorder %s522_s29, %s522_s29 }
  0x38   :  { %360 = vmatpush3.msra.mxu0 %v93_v2  ;;  %395 = vmatpush3.msra.mxu1 %v187_v7  ;;  %v86_v15 = vld [vmem:[#allocation7 + $0x38] sm:$0xff]  ;;  %v182_v16 = vld [vmem:[#allocation8 + $0x48] sm:$0xff]  ;;  %v85_v17 = vld [vmem:[#allocation7 + $0x30] sm:$0xff] }
  0x39   :  { %361 = vmatprep.subr.mxu0 %v556_v0  ;;  %396 = vmatprep.subr.mxu1 %v556_v0  ;;  %v181_v18 = vld [vmem:[#allocation8 + $0x40] sm:$0xff]  ;;  %v84_v19 = vld [vmem:[#allocation7 + $0x28] sm:$0xff]  ;;  %v180_v20 = vld [vmem:[#allocation8 + $0x38] sm:$0xff]  ;;  %p529_p9 = por %p528_p8, %p527_p7 }
  0x3a   :  { %362 = vmatpush3.msra.mxu0 %v92_v3  ;;  %397 = vmatpush3.msra.mxu1 %v186_v8  ;;  %v83_v21 = vld [vmem:[#allocation7 + $0x20] sm:$0xff]  ;;  %v179_v22 = vld [vmem:[#allocation8 + $0x30] sm:$0xff]  ;;  %v82_v23 = vld [vmem:[#allocation7 + $0x18] sm:$0xff] }
  0x3b   :  { %363 = vmatprep.subr.mxu0 %v556_v0  ;;  %398 = vmatprep.subr.mxu1 %v556_v0  ;;  %v178_v24 = vld [vmem:[#allocation8 + $0x28] sm:$0xff]  ;;  %v81_v25 = vld [vmem:[#allocation7 + $0x10] sm:$0xff]  ;;  %v177_v26 = vld [vmem:[#allocation8 + $0x20] sm:$0xff]  ;;  %p530_p10 = pnand %p529_p9, %p523_p6 }
  0x3c   :  { %364 = vmatpush3.msra.mxu0 %v91_v4  ;;  %399 = vmatpush3.msra.mxu1 %v185_v10  ;;  %v80_v27 = vld [vmem:[#allocation7 + $0x8] sm:$0xff]  ;;  %v176_v28 = vld [vmem:[#allocation8 + $0x18] sm:$0xff]  ;;  %v79_v29 = vld [vmem:[#allocation7] sm:$0xff] }
  0x3d   :  { %365 = vmatprep.subr.mxu0 %v556_v0  ;;  %400 = vmatprep.subr.mxu1 %v556_v0  ;;  %v78_v30 = vld [vmem:[#allocation2] sm:$0xff]  ;;  %v174_v32 = vld [vmem:[#allocation8 + $0x8] sm:$0xff]  ;;  %v173_v33 = vld [vmem:[#allocation8] sm:$0xff] }
  0x3e   :  { %366 = vmatpush3.msra.mxu0 %v90_v6  ;;  %401 = vmatpush3.msra.mxu1 %v184_v12  ;;  %v175_v31 = vld [vmem:[#allocation8 + $0x10] sm:$0xff]  ;;  %v277_v50 = vld [vmem:[#allocation5] sm:$0xff] }
  0x3f   :  { %367 = vmatprep.subr.mxu0 %v556_v0  ;;  %402 = vmatprep.subr.mxu1 %v556_v0  ;;  %v321_v34 = vld [vmem:[%s670_s3] ss:$0 sm:$0xff] }
  0x40   :  { %368 = vmatpush3.msra.mxu0 %v89_v9  ;;  %403 = vmatpush3.msra.mxu1 %v183_v14  ;;  %v322_v39 = vld [vmem:[%s672_s5] ss:$0 sm:$0xff] }
  0x41   :  { %369 = vmatprep.subr.mxu0 %v556_v0  ;;  %404 = vmatprep.subr.mxu1 %v556_v0 }
  0x42   :  { %370 = vmatpush3.msra.mxu0 %v88_v11  ;;  %405 = vmatpush3.msra.mxu1 %v182_v16 }
  0x43   :  { %371 = vmatprep.subr.mxu0 %v556_v0  ;;  %406 = vmatprep.subr.mxu1 %v556_v0 }
  0x44   :  { %372 = vmatpush3.msra.mxu0 %v87_v13  ;;  %407 = vmatpush3.msra.mxu1 %v181_v18 }
  0x45   :  { %373 = vmatprep.subr.mxu0 %v556_v0  ;;  %408 = vmatprep.subr.mxu1 %v556_v0 }
  0x46   :  { %374 = vmatpush3.msra.mxu0 %v86_v15  ;;  %409 = vmatpush3.msra.mxu1 %v180_v20 }
  0x47   :  { %375 = vmatprep.subr.mxu0 %v556_v0  ;;  %410 = vmatprep.subr.mxu1 %v556_v0 }
  0x48   :  { %376 = vmatpush3.msra.mxu0 %v85_v17  ;;  %411 = vmatpush3.msra.mxu1 %v179_v22 }
  0x49   :  { %377 = vmatprep.subr.mxu0 %v556_v0  ;;  %412 = vmatprep.subr.mxu1 %v556_v0 }
  0x4a   :  { %378 = vmatpush3.msra.mxu0 %v84_v19  ;;  %413 = vmatpush3.msra.mxu1 %v178_v24 }
  0x4b   :  { %379 = vmatprep.subr.mxu0 %v556_v0  ;;  %414 = vmatprep.subr.mxu1 %v556_v0 }
  0x4c   :  { %380 = vmatpush3.msra.mxu0 %v83_v21  ;;  %415 = vmatpush3.msra.mxu1 %v177_v26 }
  0x4d   :  { %381 = vmatprep.subr.mxu0 %v556_v0  ;;  %416 = vmatprep.subr.mxu1 %v556_v0 }
  0x4e   :  { %382 = vmatpush3.msra.mxu0 %v82_v23  ;;  %417 = vmatpush3.msra.mxu1 %v176_v28 }
  0x4f   :  { %383 = vmatprep.subr.mxu0 %v556_v0  ;;  %418 = vmatprep.subr.mxu1 %v556_v0 }
  0x50   :  { %384 = vmatpush3.msra.mxu0 %v81_v25  ;;  %419 = vmatpush3.msra.mxu1 %v175_v31 }
  0x51   :  { %385 = vmatprep.subr.mxu0 %v556_v0  ;;  %420 = vmatprep.subr.mxu1 %v556_v0 }
  0x52   :  { %386 = vmatpush3.msra.mxu0 %v80_v27  ;;  %421 = vmatpush3.msra.mxu1 %v174_v32 }
  0x53   :  { %387 = vmatprep.subr.mxu0 %v556_v0  ;;  %422 = vmatprep.subr.mxu1 %v556_v0 }
  0x54   :  { %388 = vmatpush3.msra.mxu0 %v79_v29  ;;  %423 = vmatpush3.msra.mxu1 %v173_v33 }
  0x55   :  { %390 = vmatmul.mubr.f32.vlgmr.msra.gmra.mxu0 %v78_v30 }
 0x115   :  { %v168_v35 = vpop.f32.mrf.mxu0 }
 0x116   :  { %v169_v36 = vadd.f32 %v321_v34, %v168_v35 }
 0x117   :  { %v391_v37 = vpop.f32.mrf.mxu0 }
 0x118   :  { %v172_v38 = vmax.f32 %v169_v36, 0.0 }
 0x11a   :  { %425 = vmatmul.mubr.f32.vlgmr.msra.gmra.mxu1 %v172_v38 }
 0x1da   :  { %v262_v40 = vpop.f32.mrf.mxu1 }
 0x1db   :  { %v263_v41 = vadd.f32 %v322_v39, %v262_v40 }
 0x1dc   :  { %v426_v42 = vpop.f32.mrf.mxu1 }
 0x1dd   :  { %266 = vmax.xlane.f32.xlu0 %v263_v41 }
 0x266   :  { %v267_v43 = vpop.xlane.xlu0 %266 }
 0x267   :  { %v268_v44 = vsub.f32 %v263_v41, %v267_v43 }
 0x269   :  { %v269_v45 = vmul.f32 1.442695, %v268_v44 }
 0x26b   :  { %438 = vpow2.f32 %v269_v45 }
 0x278   :  { %v439_v46 = vpop.eup %438 }
 0x279   :  { %271 = vadd.xlane.f32.xlu0 %v439_v46 }
 0x302   :  { %v272_v47 = vpop.xlane.xlu0 %271 }
 0x303   :  { %440 = vlog2.f32 %v272_v47 }
 0x310   :  { %v441_v48 = vpop.eup %440 }
 0x311   :  { %v274_v49 = vmul.f32 0.6931472, %v441_v48 }
 0x313   :  { %v275_v51 = vsub.f32 %v268_v44, %v274_v49 }
 0x315   :  { %v278_v52 = vadd.f32 %v277_v50, %v275_v51  ;;  %276 = vst [vmem:[#allocation10] sm:$0xff] %v275_v51 }
 0x317   :  { %282 = vmax.xlane.f32.xlu1 %v278_v52 }
 0x3a0   :  { %v283_v56 = vpop.xlane.xlu1 %282 }
 0x3a1   :  { %vm284_vm1 = vcmp.ge.f32.partialorder %v278_v52, %v283_v56 }
 0x3a2   :  { %v285_v57 = vsel %vm284_vm1, %v281_v55, 128.0 }
 0x3a3   :  { %286 = vmin.xlane.f32.xlu1 %v285_v57 }
 0x42c   :  { %v287_v58 = vpop.xlane.xlu1 %286 }
 0x42d   :  { %v427_v59 = vtrunc.f32 %v287_v58  ;;  %vm291_vm2 = vcmp.eq.f32.partialorder %v281_v55, %v287_v58 }
 0x42e   :  { %v292_v60 = vsel %vm291_vm2, %v275_v51, 0.0 }
 0x42f   :  { %v428_v61 = vcvt.f32.s32 %v427_v59  ;;  %293 = vadd.xlane.f32.xlu0 %v292_v60 }
 0x431   :  { %290 = vst.msk [vmem:[%s674_s7] sm:$0xff] %vm289_vm3, %v428_v61 }
 0x432   :  { %533 = shalt.err (!%p530_p10)
}
 0x433   :  { %305 = dma.vmem_to_hbm [thread:$0]  %s303_s28, 128, %s673_s6, [#allocation4]  }
 0x4b8   :  { %v294_v62 = vpop.xlane.xlu0 %293 }
 0x4b9   :  { %295 = vst.msk [vmem:[%s675_s8] sm:$0xff] %vm289_vm3, %v294_v62 }
 0x4ba   :  { %548 = dma.done.wait [#allocation4], 128  }
 0x4bb   :  { %549 = vsyncadd [#allocation4], 4294967168 }
 0x4bc   :  { %317 = vsyncpa [#allocation3], 1 }
 0x4bd   :  { %318 = vsyncpa [#allocation6], 1 }
 0x4be   :  { %319 = vsyncpa [#allocation9], 1 }
 0x4bf   :  { %320 = vsyncpa [#allocation4], 1 }

</bundles_post_ra>
